<compile_context>
chip_gen: v7x
topology: tpu7x:2x2x1
jax: 0.10.0
libtpu: 0.0.40
codegen_flags: <defaults>
</compile_context>

<pallas_src>
import functools

import jax
import jax.numpy as jnp
from jax.experimental import pallas as pl
from jax.experimental.pallas import tpu as pltpu

LEAKY_SLOPE = 0.2
BN_EPS = 1e-5
TM_MAX = 512                      # M-tile (GEMM rows), multiple of 8
VMEM_LIMIT = 48 * 1024 * 1024     # safe on v5e/v6e (128 MiB) and v7x (64 MiB) VMEM


def _round_up(x, m):
    return (x + m - 1) // m * m


# ---------------------------------------------------------------------------
# Pallas kernels (fused im2col-GEMM + bias + activation [+ BN statistics])
# ---------------------------------------------------------------------------
def _conv_leaky_kernel(p_ref, w_ref, b_ref, o_ref):
    y = jnp.dot(p_ref[...], w_ref[...], preferred_element_type=jnp.float32)
    y = y + b_ref[...]
    o_ref[...] = jnp.where(y >= 0.0, y, LEAKY_SLOPE * y)


def _conv_sigmoid_kernel(p_ref, w_ref, b_ref, o_ref):
    y = jnp.dot(p_ref[...], w_ref[...], preferred_element_type=jnp.float32)
    y = y + b_ref[...]
    o_ref[...] = pl.reciprocal(1.0 + jnp.exp(-y), approx=True)


def _conv_bias_stats_kernel(p_ref, w_ref, b_ref, y_ref, sum_ref, ssq_ref, *,
                            tm, m_actual):
    """Pass 1 of the BN layer: y = patches @ w + b, plus per-channel sum /
    sum-of-squares accumulated across all M tiles (padded rows masked out)."""
    i = pl.program_id(0)
    y = jnp.dot(p_ref[...], w_ref[...], preferred_element_type=jnp.float32)
    y = y + b_ref[...]
    y_ref[...] = y

    @pl.when(i == 0)
    def _():
        sum_ref[...] = jnp.zeros_like(sum_ref)
        ssq_ref[...] = jnp.zeros_like(ssq_ref)

    row = i * tm + jax.lax.broadcasted_iota(jnp.int32, y.shape, 0)
    ym = jnp.where(row < m_actual, y, 0.0)
    sum_ref[...] += jnp.sum(ym, axis=0, keepdims=True)
    ssq_ref[...] += jnp.sum(ym * ym, axis=0, keepdims=True)


def _bn_leaky_kernel(y_ref, scale_ref, shift_ref, o_ref):
    """Pass 2 of the BN layer: z = y*scale + shift ; LeakyReLU(z)."""
    z = y_ref[...] * scale_ref[...] + shift_ref[...]
    o_ref[...] = jnp.where(z >= 0.0, z, LEAKY_SLOPE * z)


# ---------------------------------------------------------------------------
# Plain-JAX glue
# ---------------------------------------------------------------------------
def _im2col(x_nhwc, kh, kw, stride, padding):
    """Returns (patches [N*OH*OW, KH*KW*C], OH, OW).  K order = (kh, kw, c)."""
    n, h, w, c = x_nhwc.shape
    xp = jnp.pad(x_nhwc, ((0, 0), (padding, padding), (padding, padding), (0, 0)))
    oh = (h + 2 * padding - kh) // stride + 1
    ow = (w + 2 * padding - kw) // stride + 1
    cols = []
    for i in range(kh):
        for j in range(kw):
            cols.append(xp[:, i:i + stride * oh:stride, j:j + stride * ow:stride, :])
    patches = jnp.stack(cols, axis=3)                    # (N, OH, OW, KH*KW, C)
    patches = patches.reshape(n * oh * ow, kh * kw * c)
    return patches, oh, ow


def _run_conv_layer(x_nhwc, w, b, stride, padding, act, gamma=None, beta=None):
    kh, kw, cin, cout = w.shape
    n = x_nhwc.shape[0]
    patches, oh, ow = _im2col(x_nhwc, kh, kw, stride, padding)
    m = patches.shape[0]
    k = kh * kw * cin

    # Lane/sublane friendly padding: K and C_out up to 128 lanes, M up to the
    # tile size (multiple of 8).
    k_p = _round_up(k, 128)
    cout_p = _round_up(cout, 128)
    tm = min(TM_MAX, _round_up(m, 8))
    m_p = _round_up(m, tm)
    num_tiles = m_p // tm

    # bf16 MXU inputs, f32 accumulation / epilogue.
    patches_p = jnp.pad(patches.astype(jnp.bfloat16), ((0, m_p - m), (0, k_p - k)))
    w_p = jnp.pad(w.reshape(k, cout).astype(jnp.bfloat16),
                  ((0, k_p - k), (0, cout_p - cout)))
    b_p = jnp.pad(b.reshape(1, cout).astype(jnp.float32), ((0, 0), (0, cout_p - cout)))

    gemm_in_specs = [
        pl.BlockSpec((tm, k_p), lambda i: (i, 0)),       # patches tile
        pl.BlockSpec((k_p, cout_p), lambda i: (0, 0)),   # full weights (resident)
        pl.BlockSpec((1, cout_p), lambda i: (0, 0)),     # bias
    ]
    out_tile_spec = pl.BlockSpec((tm, cout_p), lambda i: (i, 0))
    gemm_bytes = (patches_p.size * 2 + w_p.size * 2 + b_p.size * 4
                  + m_p * cout_p * 4)

    if act in ("leaky", "sigmoid"):
        kern = _conv_leaky_kernel if act == "leaky" else _conv_sigmoid_kernel
        out = pl.pallas_call(
            kern,
            out_shape=jax.ShapeDtypeStruct((m_p, cout_p), jnp.float32),
            grid=(num_tiles,),
            in_specs=gemm_in_specs,
            out_specs=out_tile_spec,
            compiler_params=pltpu.CompilerParams(
                dimension_semantics=("parallel",),
                vmem_limit_bytes=VMEM_LIMIT),
            cost_estimate=pl.CostEstimate(
                flops=2 * m_p * k_p * cout_p,
                bytes_accessed=gemm_bytes,
                transcendentals=m_p * cout_p if act == "sigmoid" else 0),
        )(patches_p, w_p, b_p)

    elif act == "bn_leaky":
        # Pass 1: GEMM + bias, plus batch statistics accumulated over all tiles
        # (grid axis is a carried reduction for sum/ssq -> "arbitrary").
        kern1 = functools.partial(_conv_bias_stats_kernel, tm=tm, m_actual=m)
        y, s1, s2 = pl.pallas_call(
            kern1,
            out_shape=(jax.ShapeDtypeStruct((m_p, cout_p), jnp.float32),
                       jax.ShapeDtypeStruct((1, cout_p), jnp.float32),
                       jax.ShapeDtypeStruct((1, cout_p), jnp.float32)),
            grid=(num_tiles,),
            in_specs=gemm_in_specs,
            out_specs=(out_tile_spec,
                       pl.BlockSpec((1, cout_p), lambda i: (0, 0)),
                       pl.BlockSpec((1, cout_p), lambda i: (0, 0))),
            compiler_params=pltpu.CompilerParams(
                dimension_semantics=("arbitrary",),
                vmem_limit_bytes=VMEM_LIMIT),
            cost_estimate=pl.CostEstimate(
                flops=2 * m_p * k_p * cout_p,
                bytes_accessed=gemm_bytes + 2 * cout_p * 4,
                transcendentals=0),
        )(patches_p, w_p, b_p)

        # Tiny per-channel math: fold BatchNorm2d(train) stats into scale/shift.
        mean = s1 / m
        var = jnp.maximum(s2 / m - mean * mean, 0.0)      # biased variance
        gamma_p = jnp.pad(gamma.reshape(1, cout).astype(jnp.float32),
                          ((0, 0), (0, cout_p - cout)))
        beta_p = jnp.pad(beta.reshape(1, cout).astype(jnp.float32),
                         ((0, 0), (0, cout_p - cout)))
        scale = gamma_p * jax.lax.rsqrt(var + BN_EPS)
        shift = beta_p - mean * scale

        # Pass 2: cheap mem-bound normalize + LeakyReLU sweep (parallel tiles).
        out = pl.pallas_call(
            _bn_leaky_kernel,
            out_shape=jax.ShapeDtypeStruct((m_p, cout_p), jnp.float32),
            grid=(num_tiles,),
            in_specs=[out_tile_spec,
                      pl.BlockSpec((1, cout_p), lambda i: (0, 0)),
                      pl.BlockSpec((1, cout_p), lambda i: (0, 0))],
            out_specs=pl.BlockSpec((tm, cout_p), lambda i: (i, 0)),
            compiler_params=pltpu.CompilerParams(
                dimension_semantics=("parallel",),
                vmem_limit_bytes=VMEM_LIMIT),
            cost_estimate=pl.CostEstimate(
                flops=2 * m_p * cout_p,
                bytes_accessed=2 * m_p * cout_p * 4,
                transcendentals=0),
        )(y, scale, shift)
    else:
        raise ValueError(act)

    out = out[:m, :cout]
    return out.reshape(n, oh, ow, cout)


# ---------------------------------------------------------------------------
# Parameter construction mirroring Discriminator.__init__
# ---------------------------------------------------------------------------
def init_discriminator_params(key, c_dim, conv_dim, num_conv_layers, output_size):
    conv_dims_in = [c_dim]
    conv_dims_out = []
    for i in range(num_conv_layers):
        p = min(3, i)
        conv_dims_in.append(conv_dim * (2 ** p))
        conv_dims_out.append(conv_dim * (2 ** p))
    conv_dims_out.append(1)

    params = []
    for i in range(num_conv_layers + 1):
        if i == num_conv_layers:
            k, stride, padding = output_size // (2 ** num_conv_layers), 1, 0
        else:
            k, stride, padding = 5, 2, 2
        cin, cout = conv_dims_in[i], conv_dims_out[i]
        key, kw_key, kb_key, kg_key, kbe_key = jax.random.split(key, 5)
        layer = dict(
            w=jax.random.normal(kw_key, (k, k, cin, cout), jnp.float32) * 0.05,
            b=jax.random.normal(kb_key, (cout,), jnp.float32) * 0.05,
            stride=stride, padding=padding,
        )
        if 0 < i < num_conv_layers:  # BatchNorm2d affine params
            layer["gamma"] = 1.0 + 0.1 * jax.random.normal(kg_key, (cout,), jnp.float32)
            layer["beta"] = 0.1 * jax.random.normal(kbe_key, (cout,), jnp.float32)
        params.append(layer)
    return params


def discriminator_forward(params, x_nchw):
    num_layers = len(params)
    x = jnp.transpose(x_nchw, (0, 2, 3, 1))  # NCHW -> NHWC
    for i, p in enumerate(params):
        if i == 0:
            act = "leaky"
        elif i == num_layers - 1:
            act = "sigmoid"
        else:
            act = "bn_leaky"
        x = _run_conv_layer(x, p["w"], p["b"], p["stride"], p["padding"], act,
                            gamma=p.get("gamma"), beta=p.get("beta"))
    return jnp.transpose(x, (0, 3, 1, 2))  # back to NCHW: (N, 1, 1, 1)


if __name__ == "__main__":
    key = jax.random.PRNGKey(0)
    k_x, k_p = jax.random.split(key)

    # Small config: opts.c_dim=4, opts.conv_dim=8, opts.num_conv_layers=2,
    # opts.output_size=16 -> conv(4->8,k5s2) LReLU ; conv(8->16,k5s2) BN+LReLU ;
    # conv(16->1,k4s1,p0) Sigmoid ; output (N,1,1,1).
    N, c_dim, conv_dim, num_conv_layers, output_size = 2, 4, 8, 2, 16

    x = jax.random.normal(k_x, (N, c_dim, output_size, output_size), jnp.float32)
    params = init_discriminator_params(k_p, c_dim, conv_dim, num_conv_layers, output_size)

    out = discriminator_forward(params, x)
    out = jax.block_until_ready(out)

    assert out.shape == (N, 1, 1, 1), out.shape
    assert bool(jnp.all(jnp.isfinite(out)))
    # approx-EUP reciprocal in the sigmoid can drift ~1e-3 outside [0, 1]
    assert bool(jnp.all((out >= -1e-2) & (out <= 1.0 + 1e-2)))
    print("KERNEL_OK")
</pallas_src>

<mosaic_0001>
module attributes {stable_mosaic.version = 11 : i64} {
  func.func @_conv_leaky_kernel(%arg0: i32, %arg1: memref<128x128xbf16, #tpu.memory_space<vmem>>, %arg2: memref<128x128xbf16, #tpu.memory_space<vmem>>, %arg3: memref<1x128xf32, #tpu.memory_space<vmem>>, %arg4: memref<128x128xf32, #tpu.memory_space<vmem>>) attributes {dimension_semantics = [#tpu.dimension_semantics<parallel>], iteration_bounds = array<i64: 1>, scalar_prefetch = 0 : i64, scratch_operands = 0 : i64, tpu.core_type = #tpu.core_type<tc>, window_params = [{transform_indices = @transform_0, window_bounds = array<i64: 128, 128>}, {pipeline_mode = #tpu.pipeline_mode<synchronous>, transform_indices = @transform_1, window_bounds = array<i64: 128, 128>}, {pipeline_mode = #tpu.pipeline_mode<synchronous>, transform_indices = @transform_2, window_bounds = array<i64: 1, 128>}, {transform_indices = @transform_3, window_bounds = array<i64: 128, 128>}]} {
    %c0 = arith.constant 0 : index
    %c0_0 = arith.constant 0 : index
    %0 = vector.load %arg1[%c0, %c0_0] : memref<128x128xbf16, #tpu.memory_space<vmem>>, vector<128x128xbf16>
    %c0_1 = arith.constant 0 : index
    %c0_2 = arith.constant 0 : index
    %1 = vector.load %arg2[%c0_1, %c0_2] : memref<128x128xbf16, #tpu.memory_space<vmem>>, vector<128x128xbf16>
    %cst = arith.constant dense<0.000000e+00> : vector<128x128xf32>
    %2 = tpu.matmul %0, %1, %cst {dimension_numbers = #tpu.dot_dimension_numbers<[1], [0], [0], [1], [0, 0, 1, 1], [], []>} : vector<128x128xbf16>, vector<128x128xbf16>, vector<128x128xf32> -> vector<128x128xf32>
    %c0_3 = arith.constant 0 : index
    %c0_4 = arith.constant 0 : index
    %3 = vector.load %arg3[%c0_3, %c0_4] : memref<1x128xf32, #tpu.memory_space<vmem>>, vector<1x128xf32>
    %4 = vector.broadcast %3 : vector<1x128xf32> to vector<128x128xf32>
    %5 = arith.addf %2, %4 : vector<128x128xf32>
    %cst_5 = arith.constant 0.000000e+00 : f32
    %6 = vector.broadcast %cst_5 : f32 to vector<128x128xf32>
    %7 = arith.cmpf oge, %5, %6 : vector<128x128xf32>
    %cst_6 = arith.constant 2.000000e-01 : f32
    %8 = vector.broadcast %cst_6 : f32 to vector<128x128xf32>
    %9 = arith.mulf %8, %5 : vector<128x128xf32>
    %10 = arith.select %7, %5, %9 : vector<128x128xi1>, vector<128x128xf32>
    %c0_7 = arith.constant 0 : index
    %c0_8 = arith.constant 0 : index
    %11 = vector.load %arg4[%c0_7, %c0_8] : memref<128x128xf32, #tpu.memory_space<vmem>>, vector<128x128xf32>
    tpu.vector_store %arg4[%c0_7, %c0_8], %10 {strides = array<i32>} : memref<128x128xf32, #tpu.memory_space<vmem>>, vector<128x128xf32>,
    return
  }
  func.func @transform_0(%arg0: i32) -> (i32, i32) {
    %c0_i32 = arith.constant 0 : i32
    %c0_i32_0 = arith.constant 0 : i32
    return %arg0, %c0_i32 : i32, i32
  }
  func.func @transform_1(%arg0: i32) -> (i32, i32) {
    %c0_i32 = arith.constant 0 : i32
    %c0_i32_0 = arith.constant 0 : i32
    %c0_i32_1 = arith.constant 0 : i32
    return %c0_i32, %c0_i32_0 : i32, i32
  }
  func.func @transform_2(%arg0: i32) -> (i32, i32) {
    %c0_i32 = arith.constant 0 : i32
    %c0_i32_0 = arith.constant 0 : i32
    %c0_i32_1 = arith.constant 0 : i32
    return %c0_i32, %c0_i32_0 : i32, i32
  }
  func.func @transform_3(%arg0: i32) -> (i32, i32) {
    %c0_i32 = arith.constant 0 : i32
    %c0_i32_0 = arith.constant 0 : i32
    return %arg0, %c0_i32 : i32, i32
  }
}

</mosaic_0001>

<bundles_post_ra>
// kernel: tpu_custom_call.1
= control target key start
LH: loop header
LB: loop body
LE: loop exit
PB: predicated region body
PF: predicated region fallthrough
CT: control target
= control target key end

     0   :  { %8 = vsyncpa [#allocation3], 0  ;;  %s618_s0 = inlined_call_operand.hbm [shape: bf16[128,128], index: 0, kind: input, shape index: {}]   ;;  %s619_s1 = inlined_call_operand.hbm [shape: bf16[128,128], index: 1, kind: input, shape index: {}]   ;;  %s620_s2 = inlined_call_operand.vmem [shape: f32[1,128], index: 2, kind: input, shape index: {}]   ;;  %s621_s3 = inlined_call_operand.hbm [shape: f32[128,128], index: 3, kind: output, shape index: {}]  }
   0x1   :  { %9 = vsyncpa [#allocation6], 0 }
   0x2   :  { %10 = vsyncpa [#allocation4], 0  ;;  %s534_s12 = smov [#allocation2]   ;;  %s462_s16 = scalar_lea.hbm %s618_s0, 1024 }
   0x3   :  { %s16_s13 = sshll.u32 %s534_s12, 4  ;;  %p463_p0 = scmp.ne.s32.totalorder %s618_s0, %s462_s16  ;;  %s17_s13 = int_to_ptr.vmem [resolvable:$true] %s16_s13 }
   0x4   :  { %p466_p1 = scmp.lt.u32.totalorder %s462_s16, %s618_s0 }
   0x6   :  { %p468_p2 = pnand %p466_p1, %p463_p0 }
   0x8   :  { %471 = shalt.err (!%p468_p2)
}
   0x9   :  { %s472_s21 = scalar_lea.vmem %s17_s13, 1024  ;;  %p477_p4 = scmp.lt.s32.totalorder %s17_s13, %s17_s13 }
   0xa   :  { %p473_p3 = scmp.ne.s32.totalorder %s17_s13, %s472_s21  ;;  %p478_p5 = scmp.lt.s32.totalorder %s472_s21, %s472_s21 }
   0xc   :  { %p479_p6 = por %p478_p5, %p477_p4 }
   0xe   :  { %p480_p7 = pnand %p479_p6, %p473_p3 }
  0x10   :  { %483 = shalt.err (!%p480_p7)
}
  0x11   :  { %s535_s22 = smov 64   ;;  %s536_s23 = smov 4  }
  0x12   :  { %22 = dma.hbm_to_vmem [thread:$0]  %s618_s0, 1024, %s17_s13, [#allocation3], %s535_s22, %s535_s22, %s536_s23  }
  0x13   :  { %s537_s26 = smov [#allocation5]   ;;  %s484_s30 = scalar_lea.hbm %s619_s1, 1024 }
  0x14   :  { %s28_s27 = sshll.u32 %s537_s26, 4  ;;  %p485_p8 = scmp.ne.s32.totalorder %s619_s1, %s484_s30  ;;  %s29_s27 = int_to_ptr.vmem [resolvable:$true] %s28_s27 }
  0x15   :  { %p488_p9 = scmp.lt.u32.totalorder %s484_s30, %s619_s1 }
  0x17   :  { %p490_p10 = pnand %p488_p9, %p485_p8 }
  0x19   :  { %493 = shalt.err (!%p490_p10)
}
  0x1a   :  { %s494_s8 = scalar_lea.vmem %s29_s27, 1024  ;;  %p499_p12 = scmp.lt.s32.totalorder %s29_s27, %s29_s27 }
  0x1b   :  { %p495_p11 = scmp.ne.s32.totalorder %s29_s27, %s494_s8  ;;  %p500_p13 = scmp.lt.s32.totalorder %s494_s8, %s494_s8 }
  0x1d   :  { %p501_p0 = por %p500_p13, %p499_p12 }
  0x1f   :  { %p502_p1 = pnand %p501_p0, %p495_p11 }
  0x21   :  { %505 = shalt.err (!%p502_p1)
}
  0x22   :  { %34 = dma.hbm_to_vmem [thread:$0]  %s619_s1, 1024, %s29_s27, [#allocation6], %s535_s22, %s535_s22, %s536_s23  }
  0x23   :  { %528 = dma.done.wait [#allocation3], 1024  }
  0x24   :  { %529 = vsyncadd [#allocation3], 4294966272 }
  0x25   :  { %530 = dma.done.wait [#allocation6], 1024  }
  0x26   :  { %531 = vsyncadd [#allocation6], 4294966272  ;;  %v446_v0 = vld [vmem:[#allocation5] sm:$0xff]   ;;  %v447_v1 = vld [vmem:[#allocation5 + $0x8] sm:$0xff]  }
  0x27   :  { %391 = vmatprep.subr.bf16.mxu0 %v446_v0  ;;  %423 = vmatprep.subr.bf16.mxu1 %v446_v0  ;;  %v448_v2 = vld [vmem:[#allocation5 + $0x10] sm:$0xff]   ;;  %v449_v3 = vld [vmem:[#allocation5 + $0x18] sm:$0xff]   ;;  %v454_v4 = vld [vmem:[#allocation2] sm:$0xff]  }
  0x28   :  { %392 = vmatpush3.bf16.msra.mxu0 %v446_v0  ;;  %431 = vmatpush3.bf16.msra.mxu1 %v446_v0  ;;  %v455_v5 = vld [vmem:[#allocation2 + $0x20] sm:$0xff]   ;;  %v451_v7 = vld [vmem:[#allocation5 + $0x28] sm:$0xff]   ;;  %v452_v8 = vld [vmem:[#allocation5 + $0x30] sm:$0xff]  }
  0x29   :  { %393 = vmatprep.subr.bf16.mxu0 %v447_v1  ;;  %424 = vmatprep.subr.bf16.mxu1 %v447_v1  ;;  %v450_v6 = vld [vmem:[#allocation5 + $0x20] sm:$0xff]   ;;  %v453_v9 = vld [vmem:[#allocation5 + $0x38] sm:$0xff]   ;;  %v456_v10 = vld [vmem:[#allocation2 + $0x8] sm:$0xff]  }
  0x2a   :  { %407 = vmatprep.mubr.bf16.mxu0 %v454_v4  ;;  %415 = vmatprep.mubr.bf16.mxu1 %v455_v5  ;;  %v457_v11 = vld [vmem:[#allocation2 + $0x28] sm:$0xff]   ;;  %v458_v12 = vld [vmem:[#allocation2 + $0x10] sm:$0xff]   ;;  %v460_v14 = vld [vmem:[#allocation2 + $0x18] sm:$0xff]  }
  0x2b   :  { %v459_v13 = vld [vmem:[#allocation2 + $0x30] sm:$0xff]   ;;  %v461_v15 = vld [vmem:[#allocation2 + $0x38] sm:$0xff]   ;;  %v588_v16 = vld [vmem:[%s620_s2] ss:$0 sm:$0xff]  ;;  %s538_s2 = smov [#allocation7]  }
  0x2c   :  { %394 = vmatpush3.bf16.msra.mxu0 %v447_v1  ;;  %432 = vmatpush3.bf16.msra.mxu1 %v447_v1  ;;  %s345_s11 = sshll.u32 %s538_s2, 4  ;;  %s346_s11 = int_to_ptr.vmem [resolvable:$true] %s345_s11 }
  0x2d   :  { %395 = vmatprep.subr.bf16.mxu0 %v448_v2  ;;  %425 = vmatprep.subr.bf16.mxu1 %v448_v2  ;;  %s506_s12 = scalar_lea.vmem %s346_s11, 2048  ;;  %p511_p3 = scmp.lt.s32.totalorder %s346_s11, %s346_s11 }
  0x2e   :  { %p507_p2 = scmp.ne.s32.totalorder %s346_s11, %s506_s12  ;;  %p512_p4 = scmp.lt.s32.totalorder %s506_s12, %s506_s12 }
  0x30   :  { %396 = vmatpush3.bf16.msra.mxu0 %v448_v2  ;;  %433 = vmatpush3.bf16.msra.mxu1 %v448_v2  ;;  %p513_p5 = por %p512_p4, %p511_p3 }
  0x31   :  { %397 = vmatprep.subr.bf16.mxu0 %v449_v3  ;;  %426 = vmatprep.subr.bf16.mxu1 %v449_v3 }
  0x32   :  { %p514_p6 = pnand %p513_p5, %p507_p2 }
  0x34   :  { %398 = vmatpush3.bf16.msra.mxu0 %v449_v3  ;;  %434 = vmatpush3.bf16.msra.mxu1 %v449_v3 }
  0x35   :  { %399 = vmatprep.subr.bf16.mxu0 %v450_v6  ;;  %427 = vmatprep.subr.bf16.mxu1 %v450_v6 }
  0x38   :  { %400 = vmatpush3.bf16.msra.mxu0 %v450_v6  ;;  %435 = vmatpush3.bf16.msra.mxu1 %v450_v6 }
  0x39   :  { %401 = vmatprep.subr.bf16.mxu0 %v451_v7  ;;  %428 = vmatprep.subr.bf16.mxu1 %v451_v7 }
  0x3c   :  { %402 = vmatpush3.bf16.msra.mxu0 %v451_v7  ;;  %436 = vmatpush3.bf16.msra.mxu1 %v451_v7 }
  0x3d   :  { %403 = vmatprep.subr.bf16.mxu0 %v452_v8  ;;  %429 = vmatprep.subr.bf16.mxu1 %v452_v8 }
  0x40   :  { %404 = vmatpush3.bf16.msra.mxu0 %v452_v8  ;;  %437 = vmatpush3.bf16.msra.mxu1 %v452_v8 }
  0x41   :  { %405 = vmatprep.subr.bf16.mxu0 %v453_v9  ;;  %430 = vmatprep.subr.bf16.mxu1 %v453_v9 }
  0x44   :  { %406 = vmatpush3.bf16.msra.mxu0 %v453_v9  ;;  %438 = vmatpush3.bf16.msra.mxu1 %v453_v9 }
  0x47   :  { %408 = vmatmul.mubr.bf16.vlgmr.msra.gmra.mrb[0].mxu0 %v456_v10  ;;  %416 = vmatmul.mubr.bf16.vlgmr.msra.gmra.mrb[0].mxu1 %v457_v11 }
  0x48   :  { %411 = vmatprep.mubr.bf16.mxu0 %v458_v12  ;;  %419 = vmatprep.mubr.bf16.mxu1 %v459_v13 }
  0x4f   :  { %412 = vmatmul.mubr.bf16.gmra.mrb[4].mxu0 %v460_v14  ;;  %420 = vmatmul.mubr.bf16.gmra.mrb[4].mxu1 %v461_v15 }
 0x11a   :  { %v409_v17 = vpop.f32.mrb[0].mxu0  ;;  %v417_v18 = vpop.f32.mrb[0].mxu1 }
 0x11b   :  { %v222_v19 = vadd.f32 %v409_v17, %v588_v16  ;;  %v254_v20 = vadd.f32 %v417_v18, %v588_v16  ;;  %v213_v21 = vpop.f32.mrb[1].mxu0  ;;  %v245_v22 = vpop.f32.mrb[1].mxu1 }
 0x11c   :  { %v214_v23 = vadd.f32 %v588_v16, %v213_v21  ;;  %v246_v24 = vadd.f32 %v588_v16, %v245_v22  ;;  %v410_v25 = vpop.f32.mrb[2].mxu0  ;;  %v418_v26 = vpop.f32.mrb[2].mxu1 }
 0x11d   :  { %vm278_vm0 = vcmp.ge.f32.partialorder %v222_v19, 0.0  ;;  %v294_v27 = vmul.f32 0.2, %v222_v19  ;;  %vm286_vm1 = vcmp.ge.f32.partialorder %v254_v20, 0.0  ;;  %v302_v28 = vmul.f32 0.2, %v254_v20 }
 0x11e   :  { %vm276_vm2 = vcmp.ge.f32.partialorder %v214_v23, 0.0  ;;  %v292_v29 = vmul.f32 0.2, %v214_v23  ;;  %vm284_vm3 = vcmp.ge.f32.partialorder %v246_v24, 0.0  ;;  %v300_v30 = vmul.f32 0.2, %v246_v24 }
 0x11f   :  { %v310_v31 = vsel %vm278_vm0, %v222_v19, %v294_v27  ;;  %v318_v32 = vsel %vm286_vm1, %v254_v20, %v302_v28  ;;  %v225_v33 = vadd.f32 %v410_v25, %v588_v16  ;;  %v257_v34 = vadd.f32 %v418_v26, %v588_v16  ;;  %v216_v35 = vpop.f32.mrb[3].mxu0  ;;  %v248_v36 = vpop.f32.mrb[3].mxu1 }
 0x120   :  { %326 = vst [vmem:[#allocation7 + $0x10] sm:$0xff] %v310_v31  ;;  %334 = vst [vmem:[#allocation7 + $0x50] sm:$0xff] %v318_v32  ;;  %v308_v37 = vsel %vm276_vm2, %v214_v23, %v292_v29  ;;  %v316_v38 = vsel %vm284_vm3, %v246_v24, %v300_v30  ;;  %v217_v39 = vadd.f32 %v588_v16, %v216_v35 }
 0x121   :  { %v249_v40 = vadd.f32 %v588_v16, %v248_v36  ;;  %324 = vst [vmem:[#allocation7] sm:$0xff] %v308_v37  ;;  %332 = vst [vmem:[#allocation7 + $0x40] sm:$0xff] %v316_v38  ;;  %vm279_vm4 = vcmp.ge.f32.partialorder %v225_v33, 0.0  ;;  %v295_v41 = vmul.f32 0.2, %v225_v33  ;;  %vm287_vm5 = vcmp.ge.f32.partialorder %v257_v34, 0.0 }
 0x122   :  { %v303_v42 = vmul.f32 0.2, %v257_v34  ;;  %vm277_vm6 = vcmp.ge.f32.partialorder %v217_v39, 0.0  ;;  %v293_v43 = vmul.f32 0.2, %v217_v39  ;;  %v413_v47 = vpop.f32.mrb[4].mxu0 }
 0x123   :  { %vm285_vm7 = vcmp.ge.f32.partialorder %v249_v40, 0.0  ;;  %v301_v44 = vmul.f32 0.2, %v249_v40  ;;  %v311_v45 = vsel %vm279_vm4, %v225_v33, %v295_v41  ;;  %v421_v48 = vpop.f32.mrb[4].mxu1  ;;  %v238_v51 = vadd.f32 %v413_v47, %v588_v16  ;;  %v229_v53 = vpop.f32.mrb[5].mxu0 }
 0x124   :  { %v319_v46 = vsel %vm287_vm5, %v257_v34, %v303_v42  ;;  %327 = vst [vmem:[#allocation7 + $0x18] sm:$0xff] %v311_v45  ;;  %v309_v49 = vsel %vm277_vm6, %v217_v39, %v293_v43  ;;  %v270_v52 = vadd.f32 %v421_v48, %v588_v16  ;;  %v261_v54 = vpop.f32.mrb[5].mxu1  ;;  %v230_v55 = vadd.f32 %v588_v16, %v229_v53  ;;  %v414_v57 = vpop.f32.mrb[6].mxu0 }
 0x125   :  { %335 = vst [vmem:[#allocation7 + $0x58] sm:$0xff] %v319_v46  ;;  %v317_v50 = vsel %vm285_vm7, %v249_v40, %v301_v44  ;;  %325 = vst [vmem:[#allocation7 + $0x8] sm:$0xff] %v309_v49  ;;  %v262_v56 = vadd.f32 %v588_v16, %v261_v54  ;;  %v422_v58 = vpop.f32.mrb[6].mxu1  ;;  %vm282_vm8 = vcmp.ge.f32.partialorder %v238_v51, 0.0  ;;  %v298_v59 = vmul.f32 0.2, %v238_v51 }
 0x126   :  { %333 = vst [vmem:[#allocation7 + $0x48] sm:$0xff] %v317_v50  ;;  %vm290_vm9 = vcmp.ge.f32.partialorder %v270_v52, 0.0  ;;  %v306_v60 = vmul.f32 0.2, %v270_v52  ;;  %vm280_vm10 = vcmp.ge.f32.partialorder %v230_v55, 0.0  ;;  %v241_v1 = vadd.f32 %v414_v57, %v588_v16  ;;  %v232_v3 = vpop.f32.mrb[7].mxu0 }
 0x127   :  { %v296_v61 = vmul.f32 0.2, %v230_v55  ;;  %vm288_vm11 = vcmp.ge.f32.partialorder %v262_v56, 0.0  ;;  %v304_v62 = vmul.f32 0.2, %v262_v56  ;;  %v314_v63 = vsel %vm282_vm8, %v238_v51, %v298_v59  ;;  %v264_v4 = vpop.f32.mrb[7].mxu1 }
 0x128   :  { %v322_v0 = vsel %vm290_vm9, %v270_v52, %v306_v60  ;;  %v273_v2 = vadd.f32 %v422_v58, %v588_v16  ;;  %330 = vst [vmem:[#allocation7 + $0x30] sm:$0xff] %v314_v63  ;;  %v233_v7 = vadd.f32 %v588_v16, %v232_v3  ;;  %v265_v8 = vadd.f32 %v588_v16, %v264_v4 }
 0x129   :  { %338 = vst [vmem:[#allocation7 + $0x70] sm:$0xff] %v322_v0  ;;  %v312_v5 = vsel %vm280_vm10, %v230_v55, %v296_v61  ;;  %v320_v6 = vsel %vm288_vm11, %v262_v56, %v304_v62  ;;  %vm283_vm12 = vcmp.ge.f32.partialorder %v241_v1, 0.0  ;;  %v299_v9 = vmul.f32 0.2, %v241_v1 }
 0x12a   :  { %328 = vst [vmem:[#allocation7 + $0x20] sm:$0xff] %v312_v5  ;;  %336 = vst [vmem:[#allocation7 + $0x60] sm:$0xff] %v320_v6  ;;  %vm291_vm13 = vcmp.ge.f32.partialorder %v273_v2, 0.0  ;;  %v307_v10 = vmul.f32 0.2, %v273_v2  ;;  %vm281_vm14 = vcmp.ge.f32.partialorder %v233_v7, 0.0 }
 0x12b   :  { %v297_v11 = vmul.f32 0.2, %v233_v7  ;;  %vm289_vm15 = vcmp.ge.f32.partialorder %v265_v8, 0.0  ;;  %v305_v12 = vmul.f32 0.2, %v265_v8  ;;  %v315_v13 = vsel %vm283_vm12, %v241_v1, %v299_v9 }
 0x12c   :  { %v323_v14 = vsel %vm291_vm13, %v273_v2, %v307_v10  ;;  %331 = vst [vmem:[#allocation7 + $0x38] sm:$0xff] %v315_v13 }
 0x12d   :  { %339 = vst [vmem:[#allocation7 + $0x78] sm:$0xff] %v323_v14  ;;  %v313_v15 = vsel %vm281_vm14, %v233_v7, %v297_v11  ;;  %v321_v17 = vsel %vm289_vm15, %v265_v8, %v305_v12 }
 0x12e   :  { %329 = vst [vmem:[#allocation7 + $0x28] sm:$0xff] %v313_v15  ;;  %337 = vst [vmem:[#allocation7 + $0x68] sm:$0xff] %v321_v17 }
 0x12f   :  { %517 = shalt.err (!%p514_p6)
}
 0x130   :  { %s518_s15 = scalar_lea.hbm %s621_s3, 2048 }
 0x131   :  { %p519_p7 = scmp.ne.s32.totalorder %s621_s3, %s518_s15  ;;  %p522_p8 = scmp.lt.u32.totalorder %s518_s15, %s621_s3 }
 0x133   :  { %p524_p9 = pnand %p522_p8, %p519_p7 }
 0x135   :  { %527 = shalt.err (!%p524_p9)
}
 0x136   :  { %s539_s20 = smov 128   ;;  %s540_s21 = smov 8  }
 0x137   :  { %351 = dma.vmem_to_hbm [thread:$0]  %s346_s11, 2048, %s621_s3, [#allocation4], %s539_s20, %s539_s20, %s540_s21  }
 0x138   :  { %532 = dma.done.wait [#allocation4], 2048  }
 0x139   :  { %533 = vsyncadd [#allocation4], 4294965248 }
 0x13a   :  { %355 = vsyncpa [#allocation3], 1 }
 0x13b   :  { %356 = vsyncpa [#allocation6], 1 }
 0x13c   :  { %357 = vsyncpa [#allocation4], 1 }

</bundles_post_ra>
